<compile_context>
chip_gen: v6e
topology: v6e:2x2x1
jax: 0.10.0
libtpu: 0.0.40
codegen_flags: <defaults>
</compile_context>

<pallas_src>
import functools
import math

import jax
import jax.numpy as jnp
from jax.experimental import pallas as pl
from jax.experimental.pallas import tpu as pltpu

# Model hyper-parameters (consistent with the module's __init__ in the baseline).
HEAD_NUM = 4
H_DIM = 32
HEAD_DIM = H_DIM // HEAD_NUM        # 8
Q_DIM = 16
K_DIM = 12
V_DIM = 12
KV_IN = K_DIM + V_DIM               # 24  (fused [key | value] feature width)

LANES = 128
PACK = LANES // H_DIM               # 4 sequence positions per 128-lane row
HEAD_STRIDE = PACK * HEAD_DIM       # 32 lanes per head group (head-major layout)
OUT_PAD = LANES                     # final projection padded to 128 lanes


def _round_up(x, m):
    return (x + m - 1) // m * m


def mha_kernel(q_ref, kv_ref, wk_ref, bk_ref, wv_ref, bv_ref, pool_ref,
               wf_ref, bf_ref, out_ref, acc_ref, *, seq_len, seq_tile):
    """Grid = (batch tile [parallel], seq tile [arbitrary, accumulated in acc_ref])."""
    s_blk = pl.program_id(1)
    last = pl.num_programs(1) - 1

    @pl.when(s_blk == 0)
    def _():
        acc_ref[...] = jnp.zeros_like(acc_ref)

    BT, SP, _ = kv_ref.shape
    kv2 = kv_ref[...].reshape(BT * SP, PACK * KV_IN)            # bf16, fused [k|v] stream

    # ---- Packed projections (MXU, bf16 in / f32 acc) ------------------------
    # Block-scattered (96,128) weights emit k / v directly in the packed
    # head-major lane layout (lane j = h*32 + p*8 + d), i.e. fully lane-dense.
    k = jnp.dot(kv2, wk_ref[...], preferred_element_type=jnp.float32) + bk_ref[...]
    v = jnp.dot(kv2, wv_ref[...], preferred_element_type=jnp.float32) + bv_ref[...]

    # ---- Per-head scores (q has the 1/sqrt(h_dim) scale folded in) ----------
    qk = (q_ref[...][:, None, :] * k.reshape(BT, SP, LANES)).reshape(BT * SP, LANES)
    # One constant 0/1 (128,128) MXU matmul pools each head's 8 lanes and
    # broadcasts the score back onto them.
    sb = jnp.dot(qk, pool_ref[...], preferred_element_type=jnp.float32)

    # ---- Softmax over the HEAD axis (baseline semantics) ---------------------
    # Heads sit at lane stride 32, so circular rolls by 32 / 64 reduce exactly
    # over the 4-head group (XLU slot; VPU stays dense).
    m = jnp.maximum(sb, pltpu.roll(sb, shift=HEAD_STRIDE, axis=1))
    m = jnp.maximum(m, pltpu.roll(m, shift=2 * HEAD_STRIDE, axis=1))
    e = jnp.exp(sb - m)
    den = e + pltpu.roll(e, shift=HEAD_STRIDE, axis=1)
    den = den + pltpu.roll(den, shift=2 * HEAD_STRIDE, axis=1)
    att = e * pl.reciprocal(den, approx=True)                   # EUP slot, ~free

    av = (att * v).reshape(BT, SP, LANES)

    # ---- Sequence reduction into the resident f32 accumulator ----------------
    # The padding mask is only paid on the last seq tile (and only if needed).
    if seq_len % seq_tile == 0:
        acc_ref[...] += jnp.sum(av, axis=1)
    else:
        @pl.when(s_blk != last)
        def _():
            acc_ref[...] += jnp.sum(av, axis=1)

        @pl.when(s_blk == last)
        def _():
            sp_i = jax.lax.broadcasted_iota(jnp.int32, (1, SP, LANES), 1)
            lane = jax.lax.broadcasted_iota(jnp.int32, (1, SP, LANES), 2)
            pos = s_blk * seq_tile + sp_i * PACK + (lane % HEAD_STRIDE) // HEAD_DIM
            acc_ref[...] += jnp.sum(jnp.where(pos < seq_len, av, 0.0), axis=1)

    # ---- Finalize: fused pack-fold + final projection, lane-dense store ------
    @pl.when(s_blk == last)
    def _():
        out_ref[...] = jnp.dot(acc_ref[...], wf_ref[...],
                               preferred_element_type=jnp.float32) + bf_ref[...]


def multihead_attention(query, key, value, params, *, batch_tile=64, seq_tile=256):
    """query: (B, 1, q_dim), key: (B, S, k_dim), value: (B, S, v_dim) -> (B, 1, h_dim).

    batch_tile / seq_tile are sweepable per chip: on v7x pick batch_tile so that
    B / batch_tile >= 2 (both TensorCores busy); on v5e/v6e larger seq_tile is fine
    (per-step working set is ~a dozen (BT*ST/4, 128) f32 temporaries).
    """
    B, q_len, _ = query.shape
    _, S, _ = key.shape
    assert q_len == 1, "module semantics (final .view) require query_size == 1"

    # Tile sizes: BT multiple of 8; ST multiple of 32 when tiling (so the packed
    # sublane dim SP = ST//4 stays (8,·)-aligned) or the full padded S otherwise.
    BT = min(batch_tile, _round_up(B, 8))
    Bp = _round_up(B, BT)

    sp_min = _round_up(S, 8)
    ST = sp_min if seq_tile >= sp_min else _round_up(seq_tile, 32)
    Sp = _round_up(S, ST)
    SP = ST // PACK

    # ---- Host-side prep (tiny XLA ops, hoisted out of the kernel) ------------
    scale = 1.0 / math.sqrt(H_DIM)

    q2d = query[:, 0, :].astype(jnp.float32)
    if Bp != B:
        q2d = jnp.pad(q2d, ((0, Bp - B), (0, 0)))
    # q projection with the 1/sqrt(h_dim) scale folded in (hoisted out of the
    # seq-reduction loop entirely), then packed to the head-major lane layout.
    q_proj = q2d @ (params['wq'].T.astype(jnp.float32) * scale) \
        + params['bq'].astype(jnp.float32) * scale                      # (Bp, 32)
    q_pack = jnp.broadcast_to(
        q_proj.reshape(Bp, HEAD_NUM, 1, HEAD_DIM),
        (Bp, HEAD_NUM, PACK, HEAD_DIM)).reshape(Bp, LANES)

    key_p = key.astype(jnp.float32)
    value_p = value.astype(jnp.float32)
    if Bp != B or Sp != S:
        key_p = jnp.pad(key_p, ((0, Bp - B), (0, Sp - S), (0, 0)))
        value_p = jnp.pad(value_p, ((0, Bp - B), (0, Sp - S), (0, 0)))
    # Fused [key | value] stream, 4 seq positions packed per row -> (Bp, Sp/4, 96) bf16.
    kv = jnp.concatenate([key_p, value_p], axis=-1)                     # (Bp, Sp, 24)
    kv_pack = kv.reshape(Bp, Sp // PACK, PACK * KV_IN).astype(jnp.bfloat16)

    # ---- Constant weight matrices (trace-time) --------------------------------
    wk_r = params['wk'].T.astype(jnp.float32).reshape(K_DIM, HEAD_NUM, HEAD_DIM)
    wv_r = params['wv'].T.astype(jnp.float32).reshape(V_DIM, HEAD_NUM, HEAD_DIM)
    zk = jnp.zeros((V_DIM, HEAD_NUM, HEAD_DIM), jnp.float32)
    zv = jnp.zeros((K_DIM, HEAD_NUM, HEAD_DIM), jnp.float32)
    wk_kv = jnp.concatenate([wk_r, zk], axis=0)                         # (24, 4, 8)
    wv_kv = jnp.concatenate([zv, wv_r], axis=0)                         # (24, 4, 8)
    eye_p = jnp.eye(PACK, dtype=jnp.float32)
    # Wk_pack[(p, g), (h, p', d)] = wk[g, h, d] * delta(p == p'); same for Wv.
    wk_pack = (eye_p[:, None, None, :, None] * wk_kv[None, :, :, None, :]) \
        .reshape(PACK * KV_IN, LANES).astype(jnp.bfloat16)
    wv_pack = (eye_p[:, None, None, :, None] * wv_kv[None, :, :, None, :]) \
        .reshape(PACK * KV_IN, LANES).astype(jnp.bfloat16)
    bk_pack = jnp.broadcast_to(params['bk'].astype(jnp.float32).reshape(HEAD_NUM, 1, HEAD_DIM),
                               (HEAD_NUM, PACK, HEAD_DIM)).reshape(1, LANES)
    bv_pack = jnp.broadcast_to(params['bv'].astype(jnp.float32).reshape(HEAD_NUM, 1, HEAD_DIM),
                               (HEAD_NUM, PACK, HEAD_DIM)).reshape(1, LANES)

    # Head pooling / broadcast matrix: 16 diagonal 8x8 blocks of ones.
    lane_idx = jnp.arange(LANES)
    pool_mat = (lane_idx[:, None] // HEAD_DIM ==
                lane_idx[None, :] // HEAD_DIM).astype(jnp.float32)

    # Pack-fold + final projection fused: each of the 4 pack copies of output
    # channel (h, d) contributes through the same wf row; padded to 128 lanes.
    wfT = params['wf'].T.astype(jnp.float32)                            # (32, 32)
    wf_rows = jnp.broadcast_to(wfT.reshape(HEAD_NUM, 1, HEAD_DIM, H_DIM),
                               (HEAD_NUM, PACK, HEAD_DIM, H_DIM)).reshape(LANES, H_DIM)
    wf_fold = jnp.zeros((LANES, OUT_PAD), jnp.float32).at[:, :H_DIM].set(wf_rows)
    bf_pad = jnp.zeros((1, OUT_PAD), jnp.float32).at[:, :H_DIM].set(
        params['bf'].astype(jnp.float32))

    # ---- pallas_call -----------------------------------------------------------
    grid = (Bp // BT, Sp // ST)
    const = lambda b, s: (0, 0)

    grid_spec = pltpu.PrefetchScalarGridSpec(
        num_scalar_prefetch=0,
        grid=grid,
        in_specs=[
            pl.BlockSpec((BT, LANES), lambda b, s: (b, 0)),              # q (packed, scaled)
            pl.BlockSpec((BT, SP, PACK * KV_IN), lambda b, s: (b, s, 0)),  # fused [k|v] stream
            pl.BlockSpec((PACK * KV_IN, LANES), const),                  # Wk packed
            pl.BlockSpec((1, LANES), const),                             # bk packed
            pl.BlockSpec((PACK * KV_IN, LANES), const),                  # Wv packed
            pl.BlockSpec((1, LANES), const),                             # bv packed
            pl.BlockSpec((LANES, LANES), const),                         # head pool/broadcast
            pl.BlockSpec((LANES, OUT_PAD), const),                       # fold + final proj
            pl.BlockSpec((1, OUT_PAD), const),                           # bf (lane-padded)
        ],
        out_specs=pl.BlockSpec((BT, OUT_PAD), lambda b, s: (b, 0)),
        scratch_shapes=[pltpu.VMEM((BT, LANES), jnp.float32)],
    )

    out_pad = pl.pallas_call(
        functools.partial(mha_kernel, seq_len=S, seq_tile=ST),
        out_shape=jax.ShapeDtypeStruct((Bp, OUT_PAD), jnp.float32),
        grid_spec=grid_spec,
        compiler_params=pltpu.CompilerParams(
            dimension_semantics=("parallel", "arbitrary"),
            vmem_limit_bytes=32 * 1024 * 1024,
        ),
    )(q_pack, kv_pack, wk_pack, bk_pack, wv_pack, bv_pack, pool_mat, wf_fold, bf_pad)

    return out_pad[:B, :H_DIM][:, None, :]


def reference(query, key, value, p):
    """Pure-JAX fp32 transcription of the PyTorch forward (mask=None)."""
    B, S, _ = key.shape
    Q = query.shape[1]
    q = (query @ p['wq'].T + p['bq']).reshape(B, Q, HEAD_NUM, HEAD_DIM)
    k = (key @ p['wk'].T + p['bk']).reshape(B, S, HEAD_NUM, HEAD_DIM)
    v = (value @ p['wv'].T + p['bv']).reshape(B, S, HEAD_NUM, HEAD_DIM)
    scores = (q * k / math.sqrt(H_DIM)).sum(-1)        # (B, S, HEAD_NUM)
    att = jax.nn.softmax(scores, axis=-1)              # softmax over heads (baseline quirk)
    out = (att[..., None] * v).sum(1).reshape(B, Q, H_DIM)
    return out @ p['wf'].T + p['bf']


def init_params(key):
    ks = jax.random.split(key, 8)

    def linear(kw, kb, out_dim, in_dim):
        bound = 1.0 / math.sqrt(in_dim)
        w = jax.random.uniform(kw, (out_dim, in_dim), jnp.float32, -bound, bound)
        b = jax.random.uniform(kb, (out_dim,), jnp.float32, -bound, bound)
        return w, b

    wq, bq = linear(ks[0], ks[1], H_DIM, Q_DIM)
    wk, bk = linear(ks[2], ks[3], H_DIM, K_DIM)
    wv, bv = linear(ks[4], ks[5], H_DIM, V_DIM)
    wf, bf = linear(ks[6], ks[7], H_DIM, H_DIM)
    return dict(wq=wq, bq=bq, wk=wk, bk=bk, wv=wv, bv=bv, wf=wf, bf=bf)


def _check(out, ref, tag):
    max_err = float(jnp.max(jnp.abs(out - ref)))
    assert jnp.allclose(out, ref, atol=2e-2, rtol=2e-2), f"{tag}: max abs err = {max_err}"


if __name__ == "__main__":
    root = jax.random.PRNGKey(0)
    kp, kq, kk, kv_key, kq2, kk2, kv2 = jax.random.split(root, 7)
    params = init_params(kp)

    # Case 1: small canonical shapes (single tile, no padding).
    B, S = 2, 8
    query = jax.random.normal(kq, (B, 1, Q_DIM), jnp.float32)
    key_in = jax.random.normal(kk, (B, S, K_DIM), jnp.float32)
    value_in = jax.random.normal(kv_key, (B, S, V_DIM), jnp.float32)
    out = jax.block_until_ready(multihead_attention(query, key_in, value_in, params))
    assert out.shape == (B, 1, H_DIM)
    _check(out, reference(query, key_in, value_in, params), "case1")

    # Case 2: exercises batch padding, the multi-tile seq reduction and the
    # last-tile padding mask (B=3 -> Bp=8, S=40 with seq_tile=32 -> 2 seq tiles).
    B2, S2 = 3, 40
    query2 = jax.random.normal(kq2, (B2, 1, Q_DIM), jnp.float32)
    key2 = jax.random.normal(kk2, (B2, S2, K_DIM), jnp.float32)
    value2 = jax.random.normal(kv2, (B2, S2, V_DIM), jnp.float32)
    out2 = jax.block_until_ready(
        multihead_attention(query2, key2, value2, params, batch_tile=8, seq_tile=32))
    assert out2.shape == (B2, 1, H_DIM)
    _check(out2, reference(query2, key2, value2, params), "case2")

    print("KERNEL_OK")
</pallas_src>

<mosaic_0001>
module attributes {stable_mosaic.version = 11 : i64} {
  func.func @mha_kernel(%arg0: i32, %arg1: i32, %arg2: memref<8x128xf32, #tpu.memory_space<vmem>>, %arg3: memref<8x2x96xbf16, #tpu.memory_space<vmem>>, %arg4: memref<96x128xbf16, #tpu.memory_space<vmem>>, %arg5: memref<1x128xf32, #tpu.memory_space<vmem>>, %arg6: memref<96x128xbf16, #tpu.memory_space<vmem>>, %arg7: memref<1x128xf32, #tpu.memory_space<vmem>>, %arg8: memref<128x128xf32, #tpu.memory_space<vmem>>, %arg9: memref<128x128xf32, #tpu.memory_space<vmem>>, %arg10: memref<1x128xf32, #tpu.memory_space<vmem>>, %arg11: memref<8x128xf32, #tpu.memory_space<vmem>>, %arg12: memref<8x128xf32, #tpu.memory_space<vmem>>) attributes {dimension_semantics = [#tpu.dimension_semantics<parallel>, #tpu.dimension_semantics<arbitrary>], iteration_bounds = array<i64: 1, 1>, scalar_prefetch = 0 : i64, scratch_operands = 1 : i64, tpu.core_type = #tpu.core_type<tc>, window_params = [{transform_indices = @transform_0, window_bounds = array<i64: 8, 128>}, {transform_indices = @transform_1, window_bounds = array<i64: 8, 2, 96>}, {pipeline_mode = #tpu.pipeline_mode<synchronous>, transform_indices = @transform_2, window_bounds = array<i64: 96, 128>}, {pipeline_mode = #tpu.pipeline_mode<synchronous>, transform_indices = @transform_3, window_bounds = array<i64: 1, 128>}, {pipeline_mode = #tpu.pipeline_mode<synchronous>, transform_indices = @transform_4, window_bounds = array<i64: 96, 128>}, {pipeline_mode = #tpu.pipeline_mode<synchronous>, transform_indices = @transform_5, window_bounds = array<i64: 1, 128>}, {pipeline_mode = #tpu.pipeline_mode<synchronous>, transform_indices = @transform_6, window_bounds = array<i64: 128, 128>}, {pipeline_mode = #tpu.pipeline_mode<synchronous>, transform_indices = @transform_7, window_bounds = array<i64: 128, 128>}, {pipeline_mode = #tpu.pipeline_mode<synchronous>, transform_indices = @transform_8, window_bounds = array<i64: 1, 128>}, {transform_indices = @transform_9, window_bounds = array<i64: 8, 128>}]} {
    %c0_i32 = arith.constant 0 : i32
    %0 = arith.cmpi eq, %arg1, %c0_i32 : i32
    %1 = arith.extui %0 : i1 to i32
    %c0_i32_0 = arith.constant 0 : i32
    %2 = arith.cmpi ne, %1, %c0_i32_0 : i32
    scf.if %2 {
      %cst_26 = arith.constant 0.000000e+00 : f32
      %44 = vector.broadcast %cst_26 : f32 to vector<8x128xf32>
      %c0_27 = arith.constant 0 : index
      %c0_28 = arith.constant 0 : index
      %45 = vector.load %arg12[%c0_27, %c0_28] : memref<8x128xf32, #tpu.memory_space<vmem>>, vector<8x128xf32>
      tpu.vector_store %arg12[%c0_27, %c0_28], %44 {strides = array<i32>} : memref<8x128xf32, #tpu.memory_space<vmem>>, vector<8x128xf32>,
    } else {
    }
    %c0 = arith.constant 0 : index
    %c0_1 = arith.constant 0 : index
    %c0_2 = arith.constant 0 : index
    %3 = vector.load %arg3[%c0, %c0_1, %c0_2] : memref<8x2x96xbf16, #tpu.memory_space<vmem>>, vector<8x2x96xbf16>
    %4 = vector.shape_cast %3 : vector<8x2x96xbf16> to vector<16x96xbf16>
    %c0_3 = arith.constant 0 : index
    %c0_4 = arith.constant 0 : index
    %5 = vector.load %arg4[%c0_3, %c0_4] : memref<96x128xbf16, #tpu.memory_space<vmem>>, vector<96x128xbf16>
    %cst = arith.constant dense<0.000000e+00> : vector<16x128xf32>
    %6 = tpu.matmul %4, %5, %cst {dimension_numbers = #tpu.dot_dimension_numbers<[1], [0], [0], [1], [0, 0, 1, 1], [], []>} : vector<16x96xbf16>, vector<96x128xbf16>, vector<16x128xf32> -> vector<16x128xf32>
    %c0_5 = arith.constant 0 : index
    %c0_6 = arith.constant 0 : index
    %7 = vector.load %arg5[%c0_5, %c0_6] : memref<1x128xf32, #tpu.memory_space<vmem>>, vector<1x128xf32>
    %8 = vector.broadcast %7 : vector<1x128xf32> to vector<16x128xf32>
    %9 = arith.addf %6, %8 : vector<16x128xf32>
    %c0_7 = arith.constant 0 : index
    %c0_8 = arith.constant 0 : index
    %10 = vector.load %arg6[%c0_7, %c0_8] : memref<96x128xbf16, #tpu.memory_space<vmem>>, vector<96x128xbf16>
    %cst_9 = arith.constant dense<0.000000e+00> : vector<16x128xf32>
    %11 = tpu.matmul %4, %10, %cst_9 {dimension_numbers = #tpu.dot_dimension_numbers<[1], [0], [0], [1], [0, 0, 1, 1], [], []>} : vector<16x96xbf16>, vector<96x128xbf16>, vector<16x128xf32> -> vector<16x128xf32>
    %c0_10 = arith.constant 0 : index
    %c0_11 = arith.constant 0 : index
    %12 = vector.load %arg7[%c0_10, %c0_11] : memref<1x128xf32, #tpu.memory_space<vmem>>, vector<1x128xf32>
    %13 = vector.broadcast %12 : vector<1x128xf32> to vector<16x128xf32>
    %14 = arith.addf %11, %13 : vector<16x128xf32>
    %c0_12 = arith.constant 0 : index
    %c0_13 = arith.constant 0 : index
    %15 = vector.load %arg2[%c0_12, %c0_13] : memref<8x128xf32, #tpu.memory_space<vmem>>, vector<8x128xf32>
    %16 = vector.shape_cast %15 : vector<8x128xf32> to vector<8x1x128xf32>
    %17 = vector.shape_cast %9 : vector<16x128xf32> to vector<8x2x128xf32>
    %18 = vector.broadcast %16 : vector<8x1x128xf32> to vector<8x2x128xf32>
    %19 = arith.mulf %18, %17 : vector<8x2x128xf32>
    %20 = vector.shape_cast %19 : vector<8x2x128xf32> to vector<16x128xf32>
    %c0_14 = arith.constant 0 : index
    %c0_15 = arith.constant 0 : index
    %21 = vector.load %arg8[%c0_14, %c0_15] : memref<128x128xf32, #tpu.memory_space<vmem>>, vector<128x128xf32>
    %cst_16 = arith.constant dense<0.000000e+00> : vector<16x128xf32>
    %22 = tpu.matmul %20, %21, %cst_16 {dimension_numbers = #tpu.dot_dimension_numbers<[1], [0], [0], [1], [0, 0, 1, 1], [], []>} : vector<16x128xf32>, vector<128x128xf32>, vector<16x128xf32> -> vector<16x128xf32>
    %c32_i32 = arith.constant 32 : i32
    %23 = tpu.dynamic_rotate %22 by %c32_i32 dim 1 : vector<16x128xf32>, i32 -> vector<16x128xf32>
    %24 = arith.maximumf %22, %23 : vector<16x128xf32>
    %c64_i32 = arith.constant 64 : i32
    %25 = tpu.dynamic_rotate %24 by %c64_i32 dim 1 : vector<16x128xf32>, i32 -> vector<16x128xf32>
    %26 = arith.maximumf %24, %25 : vector<16x128xf32>
    %27 = arith.subf %22, %26 : vector<16x128xf32>
    %28 = math.exp %27 : vector<16x128xf32>
    %c32_i32_17 = arith.constant 32 : i32
    %29 = tpu.dynamic_rotate %28 by %c32_i32_17 dim 1 : vector<16x128xf32>, i32 -> vector<16x128xf32>
    %30 = arith.addf %28, %29 : vector<16x128xf32>
    %c64_i32_18 = arith.constant 64 : i32
    %31 = tpu.dynamic_rotate %30 by %c64_i32_18 dim 1 : vector<16x128xf32>, i32 -> vector<16x128xf32>
    %32 = arith.addf %30, %31 : vector<16x128xf32>
    %33 = tpu.reciprocal %32 {approx = true} : vector<16x128xf32> -> vector<16x128xf32>
    %34 = arith.mulf %28, %33 : vector<16x128xf32>
    %35 = arith.mulf %34, %14 : vector<16x128xf32>
    %36 = vector.shape_cast %35 : vector<16x128xf32> to vector<8x2x128xf32>
    %c0_19 = arith.constant 0 : index
    %c0_20 = arith.constant 0 : index
    %37 = vector.load %arg12[%c0_19, %c0_20] : memref<8x128xf32, #tpu.memory_space<vmem>>, vector<8x128xf32>
    %cst_21 = arith.constant dense<0.000000e+00> : vector<8x128xf32>
    %38 = vector.multi_reduction <add>, %36, %cst_21 [1] : vector<8x2x128xf32> to vector<8x128xf32>
    %39 = arith.addf %37, %38 : vector<8x128xf32>
    %c0_22 = arith.constant 0 : index
    %c0_23 = arith.constant 0 : index
    %40 = vector.load %arg12[%c0_22, %c0_23] : memref<8x128xf32, #tpu.memory_space<vmem>>, vector<8x128xf32>
    tpu.vector_store %arg12[%c0_22, %c0_23], %39 {strides = array<i32>} : memref<8x128xf32, #tpu.memory_space<vmem>>, vector<8x128xf32>,
    %c0_i32_24 = arith.constant 0 : i32
    %41 = arith.cmpi eq, %arg1, %c0_i32_24 : i32
    %42 = arith.extui %41 : i1 to i32
    %c0_i32_25 = arith.constant 0 : i32
    %43 = arith.cmpi ne, %42, %c0_i32_25 : i32
    scf.if %43 {
      %c0_26 = arith.constant 0 : index
      %c0_27 = arith.constant 0 : index
      %44 = vector.load %arg12[%c0_26, %c0_27] : memref<8x128xf32, #tpu.memory_space<vmem>>, vector<8x128xf32>
      %c0_28 = arith.constant 0 : index
      %c0_29 = arith.constant 0 : index
      %45 = vector.load %arg9[%c0_28, %c0_29] : memref<128x128xf32, #tpu.memory_space<vmem>>, vector<128x128xf32>
      %cst_30 = arith.constant dense<0.000000e+00> : vector<8x128xf32>
      %46 = tpu.matmul %44, %45, %cst_30 {dimension_numbers = #tpu.dot_dimension_numbers<[1], [0], [0], [1], [0, 0, 1, 1], [], []>} : vector<8x128xf32>, vector<128x128xf32>, vector<8x128xf32> -> vector<8x128xf32>
      %c0_31 = arith.constant 0 : index
      %c0_32 = arith.constant 0 : index
      %47 = vector.load %arg10[%c0_31, %c0_32] : memref<1x128xf32, #tpu.memory_space<vmem>>, vector<1x128xf32>
      %48 = vector.broadcast %47 : vector<1x128xf32> to vector<8x128xf32>
      %49 = arith.addf %46, %48 : vector<8x128xf32>
      %c0_33 = arith.constant 0 : index
      %c0_34 = arith.constant 0 : index
      %50 = vector.load %arg11[%c0_33, %c0_34] : memref<8x128xf32, #tpu.memory_space<vmem>>, vector<8x128xf32>
      tpu.vector_store %arg11[%c0_33, %c0_34], %49 {strides = array<i32>} : memref<8x128xf32, #tpu.memory_space<vmem>>, vector<8x128xf32>,
    } else {
    }
    return
  }
  func.func @transform_0(%arg0: i32, %arg1: i32) -> (i32, i32) {
    %c0_i32 = arith.constant 0 : i32
    %c0_i32_0 = arith.constant 0 : i32
    return %arg0, %c0_i32 : i32, i32
  }
  func.func @transform_1(%arg0: i32, %arg1: i32) -> (i32, i32, i32) {
    %c0_i32 = arith.constant 0 : i32
    %c0_i32_0 = arith.constant 0 : i32
    return %arg0, %arg1, %c0_i32 : i32, i32, i32
  }
  func.func @transform_2(%arg0: i32, %arg1: i32) -> (i32, i32) {
    %c0_i32 = arith.constant 0 : i32
    %c0_i32_0 = arith.constant 0 : i32
    %c0_i32_1 = arith.constant 0 : i32
    return %c0_i32, %c0_i32_0 : i32, i32
  }
  func.func @transform_3(%arg0: i32, %arg1: i32) -> (i32, i32) {
    %c0_i32 = arith.constant 0 : i32
    %c0_i32_0 = arith.constant 0 : i32
    %c0_i32_1 = arith.constant 0 : i32
    return %c0_i32, %c0_i32_0 : i32, i32
  }
  func.func @transform_4(%arg0: i32, %arg1: i32) -> (i32, i32) {
    %c0_i32 = arith.constant 0 : i32
    %c0_i32_0 = arith.constant 0 : i32
    %c0_i32_1 = arith.constant 0 : i32
    return %c0_i32, %c0_i32_0 : i32, i32
  }
  func.func @transform_5(%arg0: i32, %arg1: i32) -> (i32, i32) {
    %c0_i32 = arith.constant 0 : i32
    %c0_i32_0 = arith.constant 0 : i32
    %c0_i32_1 = arith.constant 0 : i32
    return %c0_i32, %c0_i32_0 : i32, i32
  }
  func.func @transform_6(%arg0: i32, %arg1: i32) -> (i32, i32) {
    %c0_i32 = arith.constant 0 : i32
    %c0_i32_0 = arith.constant 0 : i32
    %c0_i32_1 = arith.constant 0 : i32
    return %c0_i32, %c0_i32_0 : i32, i32
  }
  func.func @transform_7(%arg0: i32, %arg1: i32) -> (i32, i32) {
    %c0_i32 = arith.constant 0 : i32
    %c0_i32_0 = arith.constant 0 : i32
    %c0_i32_1 = arith.constant 0 : i32
    return %c0_i32, %c0_i32_0 : i32, i32
  }
  func.func @transform_8(%arg0: i32, %arg1: i32) -> (i32, i32) {
    %c0_i32 = arith.constant 0 : i32
    %c0_i32_0 = arith.constant 0 : i32
    %c0_i32_1 = arith.constant 0 : i32
    return %c0_i32, %c0_i32_0 : i32, i32
  }
  func.func @transform_9(%arg0: i32, %arg1: i32) -> (i32, i32) {
    %c0_i32 = arith.constant 0 : i32
    %c0_i32_0 = arith.constant 0 : i32
    return %arg0, %c0_i32 : i32, i32
  }
}

</mosaic_0001>

<bundles_post_ra>
// kernel: tpu_custom_call.1
= control target key start
LH: loop header
LB: loop body
LE: loop exit
PB: predicated region body
PF: predicated region fallthrough
CT: control target
= control target key end

     0   :  { %14 = vsyncpa [#allocation4], 0  ;;  %s1503_s0 = inlined_call_operand.hbm [shape: f32[8,128], index: 0, kind: input, shape index: {}]   ;;  %s1504_s1 = inlined_call_operand.hbm [shape: bf16[8,2,96], index: 1, kind: input, shape index: {}]   ;;  %s1505_s2 = inlined_call_operand.hbm [shape: bf16[96,128], index: 2, kind: input, shape index: {}]   ;;  %s1506_s3 = inlined_call_operand.vmem [shape: f32[1,128], index: 3, kind: input, shape index: {}]   ;;  %s1507_s4 = inlined_call_operand.hbm [shape: bf16[96,128], index: 4, kind: input, shape index: {}]   ;;  %s1508_s5 = inlined_call_operand.vmem [shape: f32[1,128], index: 5, kind: input, shape index: {}]   ;;  %s1509_s6 = inlined_call_operand.hbm [shape: f32[128,128], index: 6, kind: input, shape index: {}]   ;;  %s1510_s7 = inlined_call_operand.hbm [shape: f32[128,128], index: 7, kind: input, shape index: {}]   ;;  %s1511_s8 = inlined_call_operand.vmem [shape: f32[1,128], index: 8, kind: input, shape index: {}]   ;;  %s1512_s9 = inlined_call_operand.hbm [shape: f32[8,128], index: 9, kind: output, shape index: {}]  }
   0x1   :  { %15 = vsyncpa [#allocation7], 0 }
   0x2   :  { %16 = vsyncpa [#allocation10], 0 }
   0x3   :  { %17 = vsyncpa [#allocation13], 0 }
   0x4   :  { %18 = vsyncpa [#allocation5], 0  ;;  %s1294_s30 = smov [#allocation6]  }
   0x5   :  { %s34_s10 = sshll.u32 %s1294_s30, 4  ;;  %s35_s10 = int_to_ptr.vmem [resolvable:$true] %s34_s10 }
   0x6   :  { %s1152_s11 = scalar_lea.vmem %s35_s10, 128  ;;  %p1157_p1 = scmp.lt.s32.totalorder %s35_s10, %s35_s10 }
   0x7   :  { %p1153_p0 = scmp.ne.s32.totalorder %s35_s10, %s1152_s11  ;;  %p1158_p2 = scmp.lt.s32.totalorder %s1152_s11, %s1152_s11 }
   0x9   :  { %p1159_p3 = por %p1158_p2, %p1157_p1 }
   0xb   :  { %p1160_p4 = pnand %p1159_p3, %p1153_p0 }
   0xd   :  { %1163 = shalt.err (!%p1160_p4)
}
   0xe   :  { %s1295_s12 = smov 16   ;;  %s1296_s13 = smov 1  }
   0xf   :  { %40 = dma.hbm_to_vmem [thread:$0]  %s1504_s1, 128, %s35_s10, [#allocation7], %s1295_s12, %s1295_s12, %s1296_s13  }
  0x10   :  { %s1297_s16 = smov [#allocation9]   ;;  %s1298_s18 = smov [#allocation3]  }
  0x11   :  { %s60_s17 = sshll.u32 %s1297_s16, 4  ;;  %s25_s19 = sshll.u32 %s1298_s18, 4  ;;  %s61_s17 = int_to_ptr.vmem [resolvable:$true] %s60_s17  ;;  %s26_s19 = int_to_ptr.vmem [resolvable:$true] %s25_s19 }
  0x12   :  { %s1172_s20 = scalar_lea.vmem %s61_s17, 768  ;;  %p1177_p6 = scmp.lt.s32.totalorder %s61_s17, %s61_s17 }
  0x13   :  { %p1173_p5 = scmp.ne.s32.totalorder %s61_s17, %s1172_s20  ;;  %p1178_p7 = scmp.lt.s32.totalorder %s1172_s20, %s1172_s20 }
  0x15   :  { %p1179_p8 = por %p1178_p7, %p1177_p6 }
  0x17   :  { %p1180_p9 = pnand %p1179_p8, %p1173_p5 }
  0x19   :  { %1183 = shalt.err (!%p1180_p9)
}
  0x1a   :  { %s1299_s21 = smov 64   ;;  %s1300_s22 = smov 4  }
  0x1b   :  { %66 = dma.hbm_to_vmem [thread:$0]  %s1507_s4, 768, %s61_s17, [#allocation10], %s1299_s21, %s1299_s21, %s1300_s22  }
  0x1c   :  { %s1192_s1 = scalar_lea.vmem %s26_s19, 128  ;;  %p1197_p11 = scmp.lt.s32.totalorder %s26_s19, %s26_s19 }
  0x1d   :  { %p1193_p10 = scmp.ne.s32.totalorder %s26_s19, %s1192_s1  ;;  %p1198_p12 = scmp.lt.s32.totalorder %s1192_s1, %s1192_s1 }
  0x1f   :  { %p1199_p13 = por %p1198_p12, %p1197_p11 }
  0x21   :  { %p1200_p0 = pnand %p1199_p13, %p1193_p10 }
  0x23   :  { %1203 = shalt.err (!%p1200_p0)
}
  0x24   :  { %28 = dma.hbm_to_vmem [thread:$0]  %s1503_s0, 128, %s26_s19, [#allocation4]  }
  0x25   :  { %s1301_s27 = smov [#allocation8]   ;;  %s1302_s29 = smov [#allocation11]  }
  0x26   :  { %s46_s28 = sshll.u32 %s1301_s27, 4  ;;  %s74_s30 = sshll.u32 %s1302_s29, 4  ;;  %s47_s28 = int_to_ptr.vmem [resolvable:$true] %s46_s28  ;;  %s75_s30 = int_to_ptr.vmem [resolvable:$true] %s74_s30 }
  0x27   :  { %s1212_s10 = scalar_lea.vmem %s47_s28, 768  ;;  %p1217_p2 = scmp.lt.s32.totalorder %s47_s28, %s47_s28 }
  0x28   :  { %p1213_p1 = scmp.ne.s32.totalorder %s47_s28, %s1212_s10  ;;  %p1218_p3 = scmp.lt.s32.totalorder %s1212_s10, %s1212_s10 }
  0x2a   :  { %p1219_p4 = por %p1218_p3, %p1217_p2 }
  0x2c   :  { %p1220_p5 = pnand %p1219_p4, %p1213_p1 }
  0x2e   :  { %1223 = shalt.err (!%p1220_p5)
}
  0x2f   :  { %52 = dma.hbm_to_vmem [thread:$0]  %s1505_s2, 768, %s47_s28, [#allocation7], %s1299_s21, %s1299_s21, %s1300_s22  }
  0x30   :  { %s1232_s0 = scalar_lea.vmem %s75_s30, 2048  ;;  %p1237_p7 = scmp.lt.s32.totalorder %s75_s30, %s75_s30 }
  0x31   :  { %p1233_p6 = scmp.ne.s32.totalorder %s75_s30, %s1232_s0  ;;  %p1238_p8 = scmp.lt.s32.totalorder %s1232_s0, %s1232_s0 }
  0x33   :  { %p1239_p9 = por %p1238_p8, %p1237_p7 }
  0x35   :  { %p1240_p10 = pnand %p1239_p9, %p1233_p6 }
  0x37   :  { %1243 = shalt.err (!%p1240_p10)
}
  0x38   :  { %s1303_s12 = smov 128   ;;  %s1304_s13 = smov 8  }
  0x39   :  { %80 = dma.hbm_to_vmem [thread:$0]  %s1509_s6, 2048, %s75_s30, [#allocation10], %s1303_s12, %s1303_s12, %s1304_s13  }
  0x3a   :  { %s1305_s16 = smov [#allocation12]  }
  0x3b   :  { %s86_s17 = sshll.u32 %s1305_s16, 4  ;;  %s87_s17 = int_to_ptr.vmem [resolvable:$true] %s86_s17 }
  0x3c   :  { %s1252_s18 = scalar_lea.vmem %s87_s17, 2048  ;;  %p1257_p12 = scmp.lt.s32.totalorder %s87_s17, %s87_s17 }
  0x3d   :  { %p1253_p11 = scmp.ne.s32.totalorder %s87_s17, %s1252_s18  ;;  %p1258_p13 = scmp.lt.s32.totalorder %s1252_s18, %s1252_s18 }
  0x3f   :  { %p1259_p0 = por %p1258_p13, %p1257_p12 }
  0x41   :  { %p1260_p1 = pnand %p1259_p0, %p1253_p11 }
  0x43   :  { %1263 = shalt.err (!%p1260_p1)
}
  0x44   :  { %92 = dma.hbm_to_vmem [thread:$0]  %s1510_s7, 2048, %s87_s17, [#allocation13], %s1303_s12, %s1303_s12, %s1304_s13  }
  0x45   :  { %1284 = dma.done.wait [#allocation4], 128  }
  0x46   :  { %1285 = vsyncadd [#allocation4], 4294967168 }
  0x47   :  { %1286 = dma.done.wait [#allocation7], 896  }
  0x48   :  { %1287 = vsyncadd [#allocation7], 4294966400 }
  0x49   :  { %1288 = dma.done.wait [#allocation10], 2816  }
  0x4a   :  { %1289 = vsyncadd [#allocation10], 4294964480 }
  0x4b   :  { %1290 = dma.done.wait [#allocation13], 2048  }
  0x4c   :  { %1291 = vsyncadd [#allocation13], 4294965248  ;;  %v1306_v0 = vmov 0.0   ;;  %vm1307_vm0 = vmmov 0   ;;  %v1308_v1 = vmov 1966171168   ;;  %v161_v3 = vlaneseq }
  0x4d   :  { %1003 = vmatprep.subr.bf16.mxu0 %v1306_v0  ;;  %1015 = vmatprep.mubr.msk.bf16.mxu0 %vm1307_vm0, %v1306_v0  ;;  %v159_v2 = vunpack.c.l.s4 %v1308_v1  ;;  %v1123_v4 = vld [vmem:[#allocation8 + $0x28] sm:$0xff]   ;;  %v1124_v7 = vld [vmem:[#allocation8 + $0x20] sm:$0xff]   ;;  %v1125_v8 = vld [vmem:[#allocation8 + $0x18] sm:$0xff]   ;;  %vm239_vm1 = vcmask 785408   ;;  %v1309_v53 = vmov 1983009808  }
  0x4e   :  { %1019 = vmatprep.subr.bf16.mxu1 %v1306_v0  ;;  %1031 = vmatprep.mubr.msk.bf16.mxu1 %vm1307_vm0, %v1306_v0  ;;  %v1390_v6 = vshrl.u32 %v161_v3, 7  ;;  %v119_v10 = vld [vmem:[#allocation6] sm:$0x1]  ;;  %v120_v11 = vld [vmem:[#allocation6 + $0x1] sm:$0x1]  ;;  %v1126_v23 = vld [vmem:[#allocation8 + $0x10] sm:$0xff]   ;;  %v435_v54 = vunpack.c.l.s4 %v1309_v53 }
  0x4f   :  { %v160_v5 = vunpack.c.0.s8 %v159_v2  ;;  %1004 = vmatpush3.bf16.msra.mxu0 %v1123_v4  ;;  %v121_v12 = vld [vmem:[#allocation6 + $0x2] sm:$0x1]  ;;  %v122_v13 = vld [vmem:[#allocation6 + $0x3] sm:$0x1]  ;;  %v123_v14 = vld [vmem:[#allocation6 + $0x4] sm:$0x1]  ;;  %v154_v16 = vcombine.low %v119_v10, %v120_v11 }
  0x50   :  { %1005 = vmatprep.subr.bf16.mxu0 %v1306_v0  ;;  %v124_v15 = vld [vmem:[#allocation6 + $0x5] sm:$0x1]  ;;  %v125_v17 = vld [vmem:[#allocation6 + $0x6] sm:$0x1]  ;;  %v126_v18 = vld [vmem:[#allocation6 + $0x7] sm:$0x1]  ;;  %v155_v19 = vcombine.low %v121_v12, %v122_v13  ;;  %v436_v57 = vunpack.c.0.s8 %v435_v54 }
  0x51   :  { %v1394_v9 = vsub.s32 %v160_v5, %v1390_v6  ;;  %v156_v20 = vcombine.low %v123_v14, %v124_v15  ;;  %v157_v21 = vcombine.low %v125_v17, %v126_v18  ;;  %v1127_v27 = vld [vmem:[#allocation8 + $0x8] sm:$0xff]   ;;  %v1128_v32 = vld [vmem:[#allocation8] sm:$0xff]   ;;  %v538_v33 = vld [vmem:[#allocation11 + $0x78] sm:$0xff]  ;;  %v477_v63 = vsub.s32 0, %v1390_v6  ;;  %s1311_s23 = smov [#allocation14]  }
  0x52   :  { %v537_v35 = vld [vmem:[#allocation11 + $0x70] sm:$0xff]  ;;  %v536_v36 = vld [vmem:[#allocation11 + $0x68] sm:$0xff]  ;;  %v535_v37 = vld [vmem:[#allocation11 + $0x60] sm:$0xff]  ;;  %v1418_v62 = vsub.s32 %v436_v57, %v1390_v6  ;;  %vm739_vm2 = vcmask 1041408   ;;  %vm804_vm3 = vcmask 1041409   ;;  %vm806_vm4 = vcmask 1042434  }
  0x53   :  { %1006 = vmatpush3.bf16.msra.mxu0 %v1124_v7  ;;  %v164_v22 = vrot.slane %v154_v16, %v1394_v9  ;;  %v171_v24 = vrot.slane %v155_v19, %v1394_v9  ;;  %v178_v25 = vrot.slane %v156_v20, %v1394_v9  ;;  %v185_v26 = vrot.slane %v157_v21, %v1394_v9  ;;  %v534_v38 = vld [vmem:[#allocation11 + $0x58] sm:$0xff]  ;;  %v533_v39 = vld [vmem:[#allocation11 + $0x50] sm:$0xff]  ;;  %v532_v40 = vld [vmem:[#allocation11 + $0x48] sm:$0xff]  ;;  %s925_s24 = sshll.u32 %s1311_s23, 4  ;;  %s926_s24 = int_to_ptr.vmem [resolvable:$true] %s925_s24 }
  0x54   :  { %1007 = vmatprep.subr.bf16.mxu0 %v1306_v0  ;;  %v531_v41 = vld [vmem:[#allocation11 + $0x40] sm:$0xff]  ;;  %v530_v42 = vld [vmem:[#allocation11 + $0x38] sm:$0xff]  ;;  %v529_v43 = vld [vmem:[#allocation11 + $0x30] sm:$0xff]  ;;  %vm808_vm5 = vcmask 1043459   ;;  %vm810_vm6 = vcmask 1044484   ;;  %vm812_vm7 = vcmask 1045509   ;;  %p1269_p3 = scmp.lt.s32.totalorder %s926_s24, %s926_s24 }
  0x55   :  { %v186_v28 = vcombine.low %v164_v22, %v171_v24  ;;  %v187_v29 = vcombine.low %v178_v25, %v185_v26  ;;  %v528_v44 = vld [vmem:[#allocation11 + $0x28] sm:$0xff]  ;;  %v527_v45 = vld [vmem:[#allocation11 + $0x20] sm:$0xff]  ;;  %v526_v46 = vld [vmem:[#allocation11 + $0x18] sm:$0xff]  ;;  %vm814_vm8 = vcmask 1046534   ;;  %vm816_vm9 = vcmask 1047559   ;;  %s1264_s1 = scalar_lea.vmem %s926_s24, 128 }
  0x56   :  { %v525_v47 = vld [vmem:[#allocation11 + $0x10] sm:$0xff]  ;;  %v524_v48 = vld [vmem:[#allocation11 + $0x8] sm:$0xff]  ;;  %v523_v49 = vld [vmem:[#allocation11] sm:$0xff]  ;;  %p1265_p2 = scmp.ne.s32.totalorder %s926_s24, %s1264_s1  ;;  %p1270_p4 = scmp.lt.s32.totalorder %s1264_s1, %s1264_s1 }
  0x57   :  { %1008 = vmatpush3.bf16.msra.mxu0 %v1125_v8  ;;  %v194_v30 = vrot.slane %v186_v28, %v1394_v9  ;;  %v201_v31 = vrot.slane %v187_v29, %v1394_v9  ;;  %v380_v50 = vld [vmem:[#allocation3] sm:$0xff] }
  0x58   :  { %1009 = vmatprep.subr.bf16.mxu0 %v1306_v0  ;;  %v382_v51 = vcombine.high %v380_v50, %v380_v50  ;;  %v389_v52 = vrot.slane %v380_v50, %v1394_v9  ;;  %v937_v61 = vld [vmem:[%s1506_s3] ss:$0 sm:$0xff]  ;;  %s1310_s3 = smov 32   ;;  %p1271_p5 = por %p1270_p4, %p1269_p3 }
  0x59   :  { %v1406_v34 = vcombine.low %v194_v30, %v201_v31  ;;  %v1131_v57 = vld [vmem:[#allocation9 + $0x20] sm:$0xff]  }
  0x5a   :  { %v396_v55 = vrot.slane %v382_v51, %v1394_v9  ;;  %v397_v56 = vcombine.high %v389_v52, %v389_v52  ;;  %v405_v58 = vrot.slane %v389_v52, %v1394_v9  ;;  %p1272_p6 = pnand %p1271_p5, %p1265_p2 }
  0x5b   :  { %1010 = vmatpush3.bf16.msra.mxu0 %v1126_v23 }
  0x5c   :  { %1011 = vmatprep.subr.bf16.mxu0 %v1306_v0  ;;  %v398_v59 = vcombine.high %v396_v55, %v396_v55  ;;  %v419_v60 = vrot.slane %v397_v56, %v1394_v9  ;;  %v427_v2 = vcombine.high %v405_v58, %v405_v58  ;;  %v412_v3 = vrot.slane %v396_v55, %v1394_v9  ;;  %v1130_v56 = vld [vmem:[#allocation9 + $0x28] sm:$0xff]  }
  0x5d   :  { %v478_v12 = vrot.slane %v405_v58, %v477_v63  ;;  %1020 = vmatpush3.bf16.msra.mxu1 %v1130_v56  ;;  %v1132_v58 = vld [vmem:[#allocation9 + $0x18] sm:$0xff]  }
  0x5e   :  { %v426_v4 = vrot.slane %v398_v59, %v1394_v9  ;;  %v429_v7 = vcombine.high %v419_v60, %v419_v60  ;;  %v482_v13 = vrot.slane %v419_v60, %v477_v63  ;;  %v486_v14 = vrot.slane %v427_v2, %v477_v63  ;;  %1021 = vmatprep.subr.bf16.mxu1 %v1306_v0  ;;  %v1133_v59 = vld [vmem:[#allocation9 + $0x10] sm:$0xff]   ;;  %v1134_v60 = vld [vmem:[#allocation9 + $0x8] sm:$0xff]  }
  0x5f   :  { %1012 = vmatpush3.bf16.msra.mxu0 %v1127_v27  ;;  %v428_v16 = vcombine.high %v412_v3, %v412_v3  ;;  %v494_v21 = vrot.slane %v412_v3, %v477_v63 }
  0x60   :  { %1013 = vmatprep.subr.bf16.mxu0 %v1306_v0  ;;  %v430_v17 = vcombine.high %v426_v4, %v426_v4  ;;  %v490_v19 = vrot.slane %v429_v7, %v477_v63  ;;  %v498_v27 = vrot.slane %v426_v4, %v477_v63 }
  0x61   :  { %v502_v28 = vrot.slane %v428_v16, %v477_v63  ;;  %1022 = vmatpush3.bf16.msra.mxu1 %v1131_v57 }
  0x62   :  { %v506_v29 = vrot.slane %v430_v17, %v477_v63  ;;  %1023 = vmatprep.subr.bf16.mxu1 %v1306_v0 }
  0x63   :  { %1014 = vmatpush3.bf16.msra.mxu0 %v1128_v32 }
  0x64   :  { %1035 = vmatprep.subr.mxu0 %v538_v33 }
  0x65   :  { %1024 = vmatpush3.bf16.msra.mxu1 %v1132_v58 }
  0x66   :  { %1016 = vmatmul.mubr.msk.bf16.vlgmr.msra.gmra.mxu0 %vm239_vm1, %v1406_v34  ;;  %1025 = vmatprep.subr.bf16.mxu1 %v1306_v0 }
  0x67   :  { %1036 = vmatpush3.msra.mxu0 %v538_v33 }
  0x68   :  { %1037 = vmatprep.subr.mxu0 %v537_v35 }
  0x69   :  { %1038 = vmatpush3.msra.mxu0 %v537_v35  ;;  %1026 = vmatpush3.bf16.msra.mxu1 %v1133_v59 }
  0x6a   :  { %1039 = vmatprep.subr.mxu0 %v536_v36  ;;  %1027 = vmatprep.subr.bf16.mxu1 %v1306_v0 }
  0x6b   :  { %1040 = vmatpush3.msra.mxu0 %v536_v36 }
  0x6c   :  { %1041 = vmatprep.subr.mxu0 %v535_v37 }
  0x6d   :  { %1042 = vmatpush3.msra.mxu0 %v535_v37  ;;  %1028 = vmatpush3.bf16.msra.mxu1 %v1134_v60 }
  0x6e   :  { %1043 = vmatprep.subr.mxu0 %v534_v38  ;;  %1029 = vmatprep.subr.bf16.mxu1 %v1306_v0 }
  0x6f   :  { %1044 = vmatpush3.msra.mxu0 %v534_v38 }
  0x70   :  { %1045 = vmatprep.subr.mxu0 %v533_v39 }
  0x71   :  { %1046 = vmatpush3.msra.mxu0 %v533_v39 }
  0x72   :  { %1047 = vmatprep.subr.mxu0 %v532_v40 }
  0x73   :  { %1048 = vmatpush3.msra.mxu0 %v532_v40 }
  0x74   :  { %1049 = vmatprep.subr.mxu0 %v531_v41 }
  0x75   :  { %1050 = vmatpush3.msra.mxu0 %v531_v41 }
  0x76   :  { %1051 = vmatprep.subr.mxu0 %v530_v42 }
  0x77   :  { %1052 = vmatpush3.msra.mxu0 %v530_v42 }
  0x78   :  { %1053 = vmatprep.subr.mxu0 %v529_v43 }
  0x79   :  { %1054 = vmatpush3.msra.mxu0 %v529_v43 }
  0x7a   :  { %1055 = vmatprep.subr.mxu0 %v528_v44 }
  0x7b   :  { %1056 = vmatpush3.msra.mxu0 %v528_v44 }
  0x7c   :  { %1057 = vmatprep.subr.mxu0 %v527_v45 }
  0x7d   :  { %1058 = vmatpush3.msra.mxu0 %v527_v45 }
  0x7e   :  { %1059 = vmatprep.subr.mxu0 %v526_v46 }
  0x7f   :  { %1060 = vmatpush3.msra.mxu0 %v526_v46 }
  0x80   :  { %1061 = vmatprep.subr.mxu0 %v525_v47 }
  0x81   :  { %1062 = vmatpush3.msra.mxu0 %v525_v47 }
  0x82   :  { %1063 = vmatprep.subr.mxu0 %v524_v48 }
  0x83   :  { %1064 = vmatpush3.msra.mxu0 %v524_v48 }
  0x84   :  { %1065 = vmatprep.subr.mxu0 %v523_v49 }
  0x85   :  { %1066 = vmatpush3.msra.mxu0 %v523_v49 }
 0x126   :  { %v277_v1 = vpop.f32.mrf.mxu0 }
 0x127   :  { %v278_v5 = vadd.f32 %v937_v61, %v277_v1 }
 0x128   :  { %v1017_v8 = vpop.f32.mrf.mxu0 }
 0x129   :  { %v433_v10 = vcombine.high %v278_v5, %v278_v5  ;;  %v440_v11 = vrot.slane %v278_v5, %v1418_v62 }
 0x12a   :  { %v280_v15 = vpop.f32.mrf.mxu0 }
 0x12b   :  { %v447_v6 = vrot.slane %v433_v10, %v1418_v62  ;;  %v448_v18 = vcombine.high %v440_v11, %v440_v11  ;;  %v281_v20 = vadd.f32 %v937_v61, %v280_v15  ;;  %v515_v23 = vmul.f32 %v478_v12, %v440_v11  ;;  %v1135_v61 = vld [vmem:[#allocation9] sm:$0xff]  }
 0x12c   :  { %v1018_v22 = vpop.f32.mrf.mxu0  ;;  %1030 = vmatpush3.bf16.msra.mxu1 %v1135_v61 }
 0x12d   :  { %v449_v9 = vcombine.high %v447_v6, %v447_v6  ;;  %v516_v24 = vmul.f32 %v482_v13, %v448_v18  ;;  %v450_v25 = vcombine.high %v281_v20, %v281_v20  ;;  %v457_v26 = vrot.slane %v281_v20, %v1418_v62  ;;  %1070 = vmatprep.subr.mxu1 %v1306_v0  ;;  %v838_v20 = vld [vmem:[#allocation12 + $0x68] sm:$0xff]  ;;  %v836_v22 = vld [vmem:[#allocation12 + $0x58] sm:$0xff] }
 0x12e   :  { %v517_v30 = vmul.f32 %v486_v14, %v447_v6  ;;  %v840_v6 = vld [vmem:[#allocation12 + $0x78] sm:$0xff] }
 0x12f   :  { %v518_v31 = vmul.f32 %v490_v19, %v449_v9  ;;  %v547_v32 = vcombine.low %v515_v23, %v516_v24  ;;  %v464_v33 = vrot.slane %v450_v25, %v1418_v62  ;;  %v465_v35 = vcombine.high %v457_v26, %v457_v26  ;;  %1032 = vmatmul.mubr.msk.bf16.vlgmr.msra.gmra.mxu1 %vm239_vm1, %v1406_v34  ;;  %v839_v19 = vld [vmem:[#allocation12 + $0x70] sm:$0xff]  ;;  %v834_v23 = vld [vmem:[#allocation12 + $0x48] sm:$0xff]  ;;  %v833_v24 = vld [vmem:[#allocation12 + $0x40] sm:$0xff] }
 0x130   :  { %v519_v38 = vmul.f32 %v494_v21, %v457_v26  ;;  %1102 = vmatprep.mubr.msk.f32.mxu1 %vm1307_vm0, %v1306_v0  ;;  %1071 = vmatpush3.msra.mxu1 %v840_v6  ;;  %v837_v21 = vld [vmem:[#allocation12 + $0x60] sm:$0xff]  ;;  %v835_v9 = vld [vmem:[#allocation12 + $0x50] sm:$0xff]  ;;  %v832_v25 = vld [vmem:[#allocation12 + $0x38] sm:$0xff] }
 0x131   :  { %v466_v36 = vcombine.high %v464_v33, %v464_v33  ;;  %v548_v37 = vcombine.low %v517_v30, %v518_v31  ;;  %v520_v39 = vmul.f32 %v498_v27, %v465_v35  ;;  %v521_v40 = vmul.f32 %v502_v28, %v464_v33  ;;  %1072 = vmatprep.subr.mxu1 %v1306_v0  ;;  %v831_v26 = vld [vmem:[#allocation12 + $0x30] sm:$0xff]  ;;  %v830_v27 = vld [vmem:[#allocation12 + $0x28] sm:$0xff]  ;;  %v829_v28 = vld [vmem:[#allocation12 + $0x20] sm:$0xff] }
 0x132   :  { %v555_v42 = vrot.slane %v547_v32, %v1418_v62  ;;  %1073 = vmatpush3.msra.mxu1 %v839_v19  ;;  %v827_v30 = vld [vmem:[#allocation12 + $0x10] sm:$0xff]  ;;  %v826_v31 = vld [vmem:[#allocation12 + $0x8] sm:$0xff]  ;;  %v825_v32 = vld [vmem:[#allocation12] sm:$0xff] }
 0x133   :  { %v522_v41 = vmul.f32 %v506_v29, %v466_v36  ;;  %v562_v43 = vrot.slane %v548_v37, %v1418_v62  ;;  %v564_v44 = vcombine.low %v519_v38, %v520_v39  ;;  %1074 = vmatprep.subr.mxu1 %v1306_v0  ;;  %v828_v29 = vld [vmem:[#allocation12 + $0x18] sm:$0xff]  ;;  %v945_v38 = vld [vmem:[%s1508_s5] ss:$0 sm:$0xff] }
 0x134   :  { %1075 = vmatpush3.msra.mxu1 %v838_v20 }
 0x135   :  { %v565_v45 = vcombine.low %v521_v40, %v522_v41  ;;  %v563_v46 = vcombine.low %v555_v42, %v562_v43  ;;  %v572_v47 = vrot.slane %v564_v44, %v1418_v62  ;;  %1076 = vmatprep.subr.mxu1 %v1306_v0 }
 0x136   :  { %1077 = vmatpush3.msra.mxu1 %v837_v21 }
 0x137   :  { %1067 = vmatprep.mubr.f32.mxu0 %v563_v46  ;;  %v579_v48 = vrot.slane %v565_v45, %v1418_v62  ;;  %1078 = vmatprep.subr.mxu1 %v1306_v0 }
 0x138   :  { %1079 = vmatpush3.msra.mxu1 %v836_v22 }
 0x139   :  { %v580_v49 = vcombine.low %v572_v47, %v579_v48  ;;  %1080 = vmatprep.subr.mxu1 %v1306_v0 }
 0x13a   :  { %1081 = vmatpush3.msra.mxu1 %v835_v9 }
 0x13b   :  { %1068 = vmatmul.mubr.f32.vlgmr.msra.gmra.mxu0 %v580_v49  ;;  %1082 = vmatprep.subr.mxu1 %v1306_v0 }
 0x13c   :  { %1083 = vmatpush3.msra.mxu1 %v834_v23 }
 0x13d   :  { %1084 = vmatprep.subr.mxu1 %v1306_v0 }
 0x13e   :  { %1085 = vmatpush3.msra.mxu1 %v833_v24 }
 0x13f   :  { %1086 = vmatprep.subr.mxu1 %v1306_v0 }
 0x140   :  { %1087 = vmatpush3.msra.mxu1 %v832_v25 }
 0x141   :  { %1088 = vmatprep.subr.mxu1 %v1306_v0 }
 0x142   :  { %1089 = vmatpush3.msra.mxu1 %v831_v26 }
 0x143   :  { %1090 = vmatprep.subr.mxu1 %v1306_v0 }
 0x144   :  { %1091 = vmatpush3.msra.mxu1 %v830_v27 }
 0x145   :  { %1092 = vmatprep.subr.mxu1 %v1306_v0 }
 0x146   :  { %1093 = vmatpush3.msra.mxu1 %v829_v28 }
 0x147   :  { %1094 = vmatprep.subr.mxu1 %v1306_v0 }
 0x148   :  { %1095 = vmatpush3.msra.mxu1 %v828_v29 }
 0x149   :  { %1096 = vmatprep.subr.mxu1 %v1306_v0 }
 0x14a   :  { %1097 = vmatpush3.msra.mxu1 %v827_v30 }
 0x14b   :  { %1098 = vmatprep.subr.mxu1 %v1306_v0 }
 0x14c   :  { %1099 = vmatpush3.msra.mxu1 %v826_v31 }
 0x14d   :  { %1100 = vmatprep.subr.mxu1 %v1306_v0 }
 0x14e   :  { %1101 = vmatpush3.msra.mxu1 %v825_v32 }
 0x1ef   :  { %v1453_v34 = vpop.f32.mrf.mxu1 }
 0x1f0   :  { %v374_v39 = vadd.f32 %v945_v38, %v1453_v34 }
 0x1f1   :  { %v1033_v12 = vpop.f32.mrf.mxu1 }
 0x1f3   :  { %v1457_v16 = vpop.f32.mrf.mxu1 }
 0x1f4   :  { %v377_v45 = vadd.f32 %v945_v38, %v1457_v16 }
 0x1f5   :  { %v1034_v18 = vpop.f32.mrf.mxu1 }
 0x1fb   :  { %v1069_v50 = vpop.f32.mrf.mxu0 }
 0x1fd   :  { %v649_v51 = vpop.f32.mrf.mxu0 }
 0x1fe   :  { %658 = vrot.lane.b32.xlu0 %v649_v51, %s1310_s3 }
 0x202   :  { %660 = vrot.lane.b32.xlu0 %v1069_v50, %s1310_s3 }
 0x270   :  { %v659_v52 = vpop.permute.xlu0 %658 }
 0x271   :  { %v662_v53 = vmax.f32 %v649_v51, %v659_v52 }
 0x273   :  { %664 = vrot.lane.b32.xlu1 %v662_v53, %s1299_s21 }
 0x274   :  { %v661_v54 = vpop.permute.xlu0 %660 }
 0x275   :  { %v663_v55 = vmax.f32 %v1069_v50, %v661_v54 }
 0x277   :  { %666 = vrot.lane.b32.xlu1 %v663_v55, %s1299_s21 }
 0x2e5   :  { %v665_v63 = vpop.permute.xlu1 %664 }
 0x2e6   :  { %v668_v1 = vmax.f32 %v662_v53, %v665_v63 }
 0x2e8   :  { %v670_v2 = vsub.f32 %v649_v51, %v668_v1 }
 0x2e9   :  { %v667_v3 = vpop.permute.xlu1 %666 }
 0x2ea   :  { %v672_v4 = vmul.f32 1.442695, %v670_v2  ;;  %v669_v5 = vmax.f32 %v663_v55, %v667_v3 }
 0x2ec   :  { %1136 = vpow2.f32 %v672_v4  ;;  %v671_v7 = vsub.f32 %v1069_v50, %v669_v5 }
 0x2ee   :  { %v674_v8 = vmul.f32 1.442695, %v671_v7 }
 0x2f0   :  { %1138 = vpow2.f32 %v674_v8 }
 0x2f9   :  { %v1445_v10 = vpop.eup %1136 }
 0x2fa   :  { %676 = vrot.lane.b32.xlu0 %v1445_v10, %s1310_s3 }
 0x2fd   :  { %v1449_v11 = vpop.eup %1138 }
 0x2fe   :  { %678 = vrot.lane.b32.xlu1 %v1449_v11, %s1310_s3 }
 0x36c   :  { %v677_v13 = vpop.permute.xlu0 %676 }
 0x36d   :  { %v680_v14 = vadd.f32 %v1445_v10, %v677_v13 }
 0x36f   :  { %682 = vrot.lane.b32.xlu0 %v680_v14, %s1299_s21 }
 0x370   :  { %v679_v15 = vpop.permute.xlu1 %678 }
 0x371   :  { %v681_v17 = vadd.f32 %v1449_v11, %v679_v15 }
 0x373   :  { %684 = vrot.lane.b32.xlu1 %v681_v17, %s1299_s21 }
 0x3e1   :  { %v683_v33 = vpop.permute.xlu0 %682 }
 0x3e2   :  { %v686_v35 = vadd.f32 %v683_v33, %v680_v14 }
 0x3e4   :  { %1140 = vrcp.f32 %v686_v35 }
 0x3e5   :  { %v685_v36 = vpop.permute.xlu1 %684 }
 0x3e6   :  { %v687_v37 = vadd.f32 %v685_v36, %v681_v17 }
 0x3e8   :  { %1142 = vrcp.f32 %v687_v37 }
 0x3f1   :  { %v1141_v40 = vpop.eup %1140 }
 0x3f2   :  { %v690_v41 = vmul.f32 %v1141_v40, %v1445_v10 }
 0x3f4   :  { %v692_v42 = vmul.f32 %v690_v41, %v374_v39 }
 0x3f5   :  { %v1143_v43 = vpop.eup %1142 }
 0x3f6   :  { %v696_v0 = vcombine.high %v692_v42, %v692_v42  ;;  %v703_v44 = vrot.slane %v692_v42, %v1418_v62  ;;  %v691_v46 = vmul.f32 %v1143_v43, %v1449_v11 }
 0x3f8   :  { %v710_v47 = vrot.slane %v696_v0, %v1418_v62  ;;  %v711_v48 = vcombine.high %v703_v44, %v703_v44  ;;  %v740_v49 = vsel %vm739_vm2, %v703_v44, 0.0  ;;  %v693_v50 = vmul.f32 %v691_v46, %v377_v45 }
 0x3f9   :  { %v741_v51 = vrot.slane %v740_v49, 4 }
 0x3fa   :  { %v712_v52 = vcombine.high %v710_v47, %v710_v47  ;;  %v747_v53 = vsel %vm739_vm2, %v711_v48, 0.0  ;;  %v754_v54 = vsel %vm739_vm2, %v710_v47, 0.0  ;;  %v713_v55 = vcombine.high %v693_v50, %v693_v50 }
 0x3fb   :  { %v742_v56 = vadd.f32 %v741_v51, %v740_v49  ;;  %v748_v57 = vrot.slane %v747_v53, 4  ;;  %v755_v58 = vrot.slane %v754_v54, 4  ;;  %v720_v59 = vrot.slane %v693_v50, %v1418_v62 }
 0x3fc   :  { %v761_v60 = vsel %vm739_vm2, %v712_v52, 0.0  ;;  %v727_v61 = vrot.slane %v713_v55, %v1418_v62  ;;  %v953_v55 = vld [vmem:[%s1511_s8] ss:$0 sm:$0xff] }
 0x3fd   :  { %v743_v63 = vrot.slane %v742_v56, 2  ;;  %v749_v1 = vadd.f32 %v748_v57, %v747_v53  ;;  %v756_v2 = vadd.f32 %v755_v58, %v754_v54  ;;  %v762_v3 = vrot.slane %v761_v60, 4 }
 0x3fe   :  { %v728_v4 = vcombine.high %v720_v59, %v720_v59  ;;  %v729_v5 = vcombine.high %v727_v61, %v727_v61  ;;  %v768_v7 = vsel %vm739_vm2, %v720_v59, 0.0  ;;  %v782_v8 = vsel %vm739_vm2, %v727_v61, 0.0 }
 0x3ff   :  { %v744_v10 = vadd.f32 %v743_v63, %v742_v56  ;;  %v750_v11 = vrot.slane %v749_v1, 2  ;;  %v757_v34 = vrot.slane %v756_v2, 2  ;;  %v763_v12 = vadd.f32 %v762_v3, %v761_v60 }
 0x400   :  { %v769_v13 = vrot.slane %v768_v7, 4  ;;  %v775_v14 = vsel %vm739_vm2, %v728_v4, 0.0  ;;  %v783_v15 = vrot.slane %v782_v8, 4  ;;  %v789_v62 = vsel %vm739_vm2, %v729_v5, 0.0 }
 0x401   :  { %v745_v16 = vrot.slane %v744_v10, 1  ;;  %v751_v17 = vadd.f32 %v750_v11, %v749_v1  ;;  %v758_v6 = vadd.f32 %v757_v34, %v756_v2  ;;  %v764_v18 = vrot.slane %v763_v12, 2 }
 0x402   :  { %v770_v19 = vadd.f32 %v769_v13, %v768_v7  ;;  %v776_v20 = vrot.slane %v775_v14, 4  ;;  %v784_v21 = vadd.f32 %v783_v15, %v782_v8  ;;  %v790_v22 = vrot.slane %v789_v62, 4 }
 0x403   :  { %v752_v9 = vrot.slane %v751_v17, 1  ;;  %v759_v23 = vrot.slane %v758_v6, 1  ;;  %v765_v24 = vadd.f32 %v764_v18, %v763_v12  ;;  %v746_v29 = vadd.f32 %v745_v16, %v744_v10 }
 0x404   :  { %v771_v25 = vrot.slane %v770_v19, 2  ;;  %v777_v26 = vadd.f32 %v776_v20, %v775_v14  ;;  %v785_v27 = vrot.slane %v784_v21, 2  ;;  %v791_v28 = vadd.f32 %v790_v22, %v789_v62 }
 0x405   :  { %v753_v30 = vadd.f32 %v752_v9, %v751_v17  ;;  %v760_v31 = vadd.f32 %v759_v23, %v758_v6  ;;  %v766_v32 = vrot.slane %v765_v24, 1 }
 0x406   :  { %v772_v33 = vadd.f32 %v771_v25, %v770_v19  ;;  %v778_v35 = vrot.slane %v777_v26, 2  ;;  %v786_v36 = vadd.f32 %v785_v27, %v784_v21  ;;  %v792_v37 = vrot.slane %v791_v28, 2 }
 0x407   :  { %v767_v38 = vadd.f32 %v766_v32, %v765_v24  ;;  %v805_v39 = vsel %vm804_vm3, %v753_v30, %v746_v29 }
 0x408   :  { %v773_v40 = vrot.slane %v772_v33, 1  ;;  %v779_v41 = vadd.f32 %v778_v35, %v777_v26  ;;  %v787_v42 = vrot.slane %v786_v36, 1  ;;  %v793_v43 = vadd.f32 %v792_v37, %v791_v28 }
 0x409   :  { %v807_v0 = vsel %vm806_vm4, %v760_v31, %v805_v39 }
 0x40a   :  { %v774_v44 = vadd.f32 %v773_v40, %v772_v33  ;;  %v780_v45 = vrot.slane %v779_v41, 1  ;;  %v794_v46 = vrot.slane %v793_v43, 1  ;;  %v788_v47 = vadd.f32 %v787_v42, %v786_v36 }
 0x40b   :  { %v809_v48 = vsel %vm808_vm5, %v767_v38, %v807_v0 }
 0x40c   :  { %v781_v49 = vadd.f32 %v780_v45, %v779_v41  ;;  %v795_v50 = vadd.f32 %v794_v46, %v793_v43  ;;  %v811_v51 = vsel %vm810_vm6, %v774_v44, %v809_v48 }
 0x40e   :  { %v813_v52 = vsel %vm812_vm7, %v781_v49, %v811_v51 }
 0x40f   :  { %v815_v53 = vsel %vm814_vm8, %v788_v47, %v813_v52 }
 0x410   :  { %v817_v54 = vsel %vm816_vm9, %v795_v50, %v815_v53 }
 0x411   :  { %1103 = vmatmul.mubr.f32.vlgmr.msra.gmra.mxu1 %v817_v54 }
 0x4d1   :  { %v914_v56 = vpop.f32.mrf.mxu1 }
 0x4d2   :  { %v915_v57 = vadd.f32 %v953_v55, %v914_v56 }
 0x4d3   :  { %v1104_v58 = vpop.f32.mrf.mxu1 }
 0x4d4   :  { %918 = vst [vmem:[#allocation14] sm:$0xff] %v915_v57 }
 0x4d5   :  { %1275 = shalt.err (!%p1272_p6)
}
 0x4d6   :  { %928 = dma.vmem_to_hbm [thread:$0]  %s926_s24, 128, %s1512_s9, [#allocation5]  }
 0x4d7   :  { %1292 = dma.done.wait [#allocation5], 128  }
 0x4d8   :  { %1293 = vsyncadd [#allocation5], 4294967168 }
 0x4d9   :  { %932 = vsyncpa [#allocation4], 1 }
 0x4da   :  { %933 = vsyncpa [#allocation7], 1 }
 0x4db   :  { %934 = vsyncpa [#allocation10], 1 }
 0x4dc   :  { %935 = vsyncpa [#allocation13], 1 }
 0x4dd   :  { %936 = vsyncpa [#allocation5], 1 }

</bundles_post_ra>
